<compile_context>
chip_gen: v7x
topology: tpu7x:2x2x1
jax: 0.10.0
libtpu: 0.0.40
codegen_flags: <defaults>
</compile_context>

<pallas_src>
import jax
import jax.numpy as jnp
from jax.experimental import pallas as pl
from jax.experimental.pallas import tpu as pltpu

NEG_SLOPE = 0.01                  # nn.LeakyReLU default
_TARGET_TILE_BYTES = 4 << 20      # ~4 MiB per input buffer
_SMALL_BYTES = 64 * 1024          # below this, plain XLA elementwise wins
_VMEM_LIMIT = 32 << 20            # fits every generation (v7x phys = 64 MiB)


def _round_up(a: int, m: int) -> int:
    return ((a + m - 1) // m) * m


def _kernel(shift_ref, x_ref, o_ref):
    """o = leaky_relu(x - s) + s ; s is an SMEM scalar."""
    s = shift_ref[0]
    y = x_ref[...].astype(jnp.float32) - s
    # maximum(y, slope*y) == leaky_relu(y) exactly for 0 < slope < 1.
    o_ref[...] = (jnp.maximum(y, NEG_SLOPE * y) + s).astype(o_ref.dtype)


def _pointwise_jnp(x, shift):
    """Plain-JAX path (tiny tensors / tail elements)."""
    s = jnp.asarray(shift, dtype=jnp.float32)
    y = x.astype(jnp.float32) - s
    return (jnp.maximum(y, NEG_SLOPE * y) + s).astype(x.dtype)


def _call_kernel(x2d, shift_arr):
    """Run the Pallas kernel on a lane-dense (rows, lane) slab."""
    rows, lane = x2d.shape
    itemsize = x2d.dtype.itemsize
    sub = max(8, 32 // itemsize)                      # sublane multiple per dtype
    tm_cap = max(sub, (_TARGET_TILE_BYTES // (lane * itemsize)) // sub * sub)
    if rows <= tm_cap:
        # split into >=2 blocks so v7x's two TensorCores both get work
        tm = min(tm_cap, max(sub, _round_up(pl.cdiv(rows, 2), sub)))
    else:
        tm = tm_cap
    grid = (pl.cdiv(rows, tm),)                       # partial last block is masked
    n = rows * lane

    return pl.pallas_call(
        _kernel,
        out_shape=jax.ShapeDtypeStruct(x2d.shape, x2d.dtype),
        grid=grid,
        in_specs=[
            pl.BlockSpec(memory_space=pltpu.MemorySpace.SMEM),   # shift scalar
            pl.BlockSpec((tm, lane), lambda i: (i, 0)),
        ],
        out_specs=pl.BlockSpec((tm, lane), lambda i: (i, 0)),
        compiler_params=pltpu.CompilerParams(
            dimension_semantics=("parallel",),
            vmem_limit_bytes=_VMEM_LIMIT),
        cost_estimate=pl.CostEstimate(
            flops=4 * n,
            transcendentals=0,
            bytes_accessed=2 * n * itemsize),
    )(shift_arr, x2d)


def shift_leaky_relu(x: jax.Array, shift) -> jax.Array:
    """leaky_relu(x - shift) + shift, elementwise, any shape."""
    total = x.size
    itemsize = x.dtype.itemsize

    # Tiny tensors: custom-call dispatch dwarfs the transfer; let XLA fuse it.
    if total * itemsize < _SMALL_BYTES:
        return _pointwise_jnp(x, shift)

    shift_arr = jnp.asarray(shift, dtype=jnp.float32).reshape((1,))
    flat = x.reshape(-1)

    lane = 0
    for cand in (1024, 512, 256, 128):
        if total % cand == 0:
            lane = cand
            break

    if lane:
        out2d = _call_kernel(flat.reshape(total // lane, lane), shift_arr)
        return out2d.reshape(x.shape)

    # Rare: element count not a multiple of 128.  Kernel handles the
    # 1024-aligned bulk; the <=1023-element tail is plain jnp.
    bulk = (total // 1024) * 1024
    out_bulk = _call_kernel(flat[:bulk].reshape(bulk // 1024, 1024),
                            shift_arr).reshape(-1)
    out_tail = _pointwise_jnp(flat[bulk:], shift)
    return jnp.concatenate([out_bulk, out_tail]).reshape(x.shape)


def _reference(x, shift):
    y = x - shift
    return jnp.where(y >= 0, y, NEG_SLOPE * y) + shift


if __name__ == "__main__":
    key = jax.random.PRNGKey(0)
    shift = 0.5  # the module's __init__(shift) parameter

    # 1) Small NCHW map consistent with the module's usage -> jnp fallback path.
    x_small = jax.random.normal(key, (2, 4, 16, 16), dtype=jnp.float32)
    out_small = jax.block_until_ready(shift_leaky_relu(x_small, shift))
    assert out_small.shape == x_small.shape and out_small.dtype == x_small.dtype
    assert jnp.allclose(out_small, _reference(x_small, shift), atol=1e-6, rtol=1e-6)

    # 2) Kernel path, element count a multiple of 1024 (lane = 1024).
    x1 = jax.random.normal(jax.random.PRNGKey(1), (2, 8, 32, 128), dtype=jnp.float32)
    out1 = jax.block_until_ready(shift_leaky_relu(x1, shift))
    assert jnp.allclose(out1, _reference(x1, shift), atol=1e-6, rtol=1e-6)

    # 3) Kernel path, multiple of 128 but not 1024 (lane = 128, ragged row grid).
    x2 = jax.random.normal(jax.random.PRNGKey(2), (1, 3, 43, 128), dtype=jnp.float32)
    out2 = jax.block_until_ready(shift_leaky_relu(x2, shift))
    assert jnp.allclose(out2, _reference(x2, shift), atol=1e-6, rtol=1e-6)

    # 4) Kernel bulk + jnp tail path (element count not a multiple of 128).
    x3 = jax.random.normal(jax.random.PRNGKey(3), (1, 5, 37, 91), dtype=jnp.float32)
    out3 = jax.block_until_ready(shift_leaky_relu(x3, shift))
    assert jnp.allclose(out3, _reference(x3, shift), atol=1e-6, rtol=1e-6)

    # 5) shift as a traced value under jit (no ConcretizationTypeError / retrace
    #    per value, since shift is an SMEM operand rather than a baked constant).
    jitted = jax.jit(shift_leaky_relu)
    out_j = jax.block_until_ready(jitted(x1, jnp.float32(shift)))
    assert jnp.allclose(out_j, _reference(x1, shift), atol=1e-6, rtol=1e-6)

    print("KERNEL_OK")
</pallas_src>

<mosaic_0001>
module attributes {stable_mosaic.version = 11 : i64} {
  func.func @_kernel(%arg0: i32, %arg1: memref<1xf32, #tpu.memory_space<smem>>, %arg2: memref<32x1024xf32, #tpu.memory_space<vmem>>, %arg3: memref<32x1024xf32, #tpu.memory_space<vmem>>) attributes {dimension_semantics = [#tpu.dimension_semantics<parallel>], iteration_bounds = array<i64: 2>, scalar_prefetch = 0 : i64, scratch_operands = 0 : i64, tpu.core_type = #tpu.core_type<tc>, window_params = [{transform_indices = @transform_0, window_bounds = array<i64: 1>}, {transform_indices = @transform_1, window_bounds = array<i64: 32, 1024>}, {transform_indices = @transform_2, window_bounds = array<i64: 32, 1024>}]} {
    %c0 = arith.constant 0 : index
    %0 = memref.load %arg1[%c0] : memref<1xf32, #tpu.memory_space<smem>>
    %c0_0 = arith.constant 0 : index
    %c0_1 = arith.constant 0 : index
    %1 = vector.load %arg2[%c0_0, %c0_1] : memref<32x1024xf32, #tpu.memory_space<vmem>>, vector<32x1024xf32>
    %2 = vector.broadcast %0 : f32 to vector<32x1024xf32>
    %3 = arith.subf %1, %2 : vector<32x1024xf32>
    %cst = arith.constant 0.00999999977 : f32
    %4 = vector.broadcast %cst : f32 to vector<32x1024xf32>
    %5 = arith.mulf %4, %3 : vector<32x1024xf32>
    %6 = arith.maximumf %3, %5 : vector<32x1024xf32>
    %7 = vector.broadcast %0 : f32 to vector<32x1024xf32>
    %8 = arith.addf %6, %7 : vector<32x1024xf32>
    %c0_2 = arith.constant 0 : index
    %c0_3 = arith.constant 0 : index
    %9 = vector.load %arg3[%c0_2, %c0_3] : memref<32x1024xf32, #tpu.memory_space<vmem>>, vector<32x1024xf32>
    tpu.vector_store %arg3[%c0_2, %c0_3], %8 {strides = array<i32>} : memref<32x1024xf32, #tpu.memory_space<vmem>>, vector<32x1024xf32>,
    return
  }
  func.func @transform_0(%arg0: i32) -> i32 {
    %c0_i32 = arith.constant 0 : i32
    %c0_i32_0 = arith.constant 0 : i32
    return %c0_i32 : i32
  }
  func.func @transform_1(%arg0: i32) -> (i32, i32) {
    %c0_i32 = arith.constant 0 : i32
    %c0_i32_0 = arith.constant 0 : i32
    return %arg0, %c0_i32 : i32, i32
  }
  func.func @transform_2(%arg0: i32) -> (i32, i32) {
    %c0_i32 = arith.constant 0 : i32
    %c0_i32_0 = arith.constant 0 : i32
    return %arg0, %c0_i32 : i32, i32
  }
}

</mosaic_0001>

<bundles_post_ra>
// kernel: tpu_custom_call.1
= control target key start
LH: loop header
LB: loop body
LE: loop exit
PB: predicated region body
PF: predicated region fallthrough
CT: control target
= control target key end

     0   :  { %s941_s0 = inlined_call_operand.<no memory space> [shape: f32[1], index: 0, kind: input, shape index: {}]   ;;  %s942_s1 = inlined_call_operand.hbm [shape: f32[64,1024], index: 1, kind: input, shape index: {}]   ;;  %s943_s2 = inlined_call_operand.hbm [shape: f32[64,1024], index: 2, kind: output, shape index: {}]  }
   0x1   :  { %7 = sst [smem:[#allocation2]] %s941_s0 }
   0x2   :  { %8 = vsyncpa [#allocation4], 0 }
   0x3   :  { %10 = vsyncpa [#allocation4 + $0x1], 0 }
   0x4   :  { %11 = vsyncpa [#allocation5], 0 }
   0x5   :  { %13 = vsyncpa [#allocation5 + $0x1], 0  ;;  %s640_s11 = smov 0   ;;  %s642_s12 = smov 0  }
   0x6   :  { %s644_s13 = smov 0   ;;  %s646_s14 = smov 0  }
   0x7 LB: > { %s661_s0 = sadd.s32 4294967295, %s614_s14   ;;  %s448_s15 = sadd.s32 4294967294, %s614_s14   ;;  %s614_s14 = sphi %s646_s14, %s956_s14   ;;  %s610_s13 = sphi %s644_s13, %s955_s13   ;;  %s606_s12 = sphi %s642_s12, %s954_s12   ;;  %s602_s11 = sphi %s640_s11, %s953_s11  }
   0x8   : > { %s665_s16 = sadd.s32 1, %s614_s14   ;;  %s47_s17 = sadd.s32 1, %s610_s13 }
   0x9   : > { %s44_s18 = ssub.s32 %s614_s14, %s665_s16  ;;  %p54_p0 = scmp.ne.s32.totalorder %s610_s13, %s606_s12 }
   0xa   : > { %p45_p1 = scmp.eq.s32.totalorder %s44_s18, 0  ;;  %p55_p2 = scmp.eq.s32.totalorder %s614_s14, 0 }
   0xb   : > { %p60_p3 = scmp.ne.s32.totalorder %s606_s12, %s602_s11  ;;  %p61_p4 = scmp.eq.s32.totalorder %s661_s0, 0 }
   0xc   : > { %s677_s19 = scalar_select %p45_p1, %s610_s13, %s47_s17  }
   0xd   : > { %p679_p5 = por %p55_p2, %p54_p0  ;;  %p683_p6 = por %p61_p4, %p60_p3 }
   0xe   : > { %p84_p7 = scmp.eq.s32.totalorder %s661_s0, 1  ;;  %p90_p8 = scmp.eq.s32.totalorder %s448_s15, 1 }
   0xf   : > { %p480_p10 = scmp.lt.s32.totalorder %s614_s14, 2  ;;  %s113_s24 = sand.u32 1, %s610_s13  }
  0x10   : > { %p690_p11 = por %p84_p7, %p54_p0  ;;  %p694_p12 = por %p90_p8, %p60_p3 }
  0x11   : > { %s465_s25 = sshll.u32 %s614_s14, 12  ;;  %s451_s26 = sshll.u32 %s113_s24, 8 }
  0x12   : > { %s947_s22 = scalar_select %p690_p11, 1, 0 }
  0x13   : > { %s948_s23 = scalar_select %p694_p12, 1, 0 }
  0x14   : > { %s703_s29 = scalar_lea.hbm %s942_s1, %s465_s25  ;;  %s117_s30 = scalar_lea.vmem [#allocation3], %s451_s26 }
  0x15   : > { %s125_s3 = sshll.u32 %s117_s30, 4  ;;  %p707_p13 = pnand %p480_p10, %p679_p5  ;;  %s711_s3 = int_to_ptr.vmem [resolvable:$true] %s125_s3 }
  0x16   : > { %s713_s5 = scalar_lea.sflag [#allocation4], %s113_s24  ;;  %s518_s6 = scalar_lea.hbm %s703_s29, 4096 }
  0x17   : > { %p519_p0 = scmp.ne.s32.totalorder %s703_s29, %s518_s6  ;;  %p520_p1 = pneg %p707_p13 }
  0x18   : > { %s523_s9 = scalar_lea.hbm %s942_s1, 8192  ;;  %p524_p4 = scmp.lt.u32.totalorder %s703_s29, %s942_s1 }
  0x19   : > { %p521_p2 = pnand %p520_p1, %p519_p0  ;;  %p525_p5 = scmp.lt.u32.totalorder %s523_s9, %s518_s6 }
  0x1a   : > { %p527_p8 = scmp.lt.u32.totalorder %s518_s6, %s703_s29 }
  0x1b   : > { %p522_p3 = pneg %p521_p2  ;;  %p526_p7 = por %p525_p5, %p524_p4 }
  0x1d   : > { %p528_p10 = por %p527_p8, %p526_p7 }
  0x1f   : > { %p529_p9 = pnand %p528_p10, %p522_p3 }
  0x21   : > { %532 = shalt.err (!%p529_p9)
}
  0x22   : > { %s533_s17 = scalar_lea.vmem %s711_s3, 4096  ;;  %s616_s18 = smov [#allocation3]  }
  0x23   : > { %p534_p0 = scmp.ne.s32.totalorder %s711_s3, %s533_s17  ;;  %s538_s20 = sshll.u32 %s616_s18, 4  ;;  %s539_s20 = int_to_ptr.vmem [resolvable:$false] %s538_s20 }
  0x24   : > { %s540_s24 = scalar_lea.vmem %s539_s20, 8192  ;;  %p541_p11 = scmp.lt.s32.totalorder %s711_s3, %s539_s20 }
  0x25   : > { %p536_p2 = pnand %p534_p0, %p520_p1  ;;  %p542_p4 = scmp.lt.s32.totalorder %s540_s24, %s533_s17 }
  0x27   : > { %p537_p12 = pneg %p536_p2  ;;  %p543_p5 = por %p542_p4, %p541_p11 }
  0x29   : > { %p544_p7 = pnand %p543_p5, %p537_p12 }
  0x2b   : > { %547 = shalt.err (!%p544_p7)
}
  0x2c   : > { %s617_s25 = smov 1024   ;;  %s618_s26 = smov 64  }
  0x2d   : > { %475 = dma.hbm_to_vmem [thread:$0]  (!%p707_p13), %s703_s29, 4096, %s711_s3, %s713_s5, %s617_s25, %s617_s25, %s618_s26  }
  0x2e   : > { %p455_p9 = scmp.ge.s32.totalorder %s614_s14, 1  ;;  %p133_p1 = scmp.lt.s32.totalorder %s614_s14, 3 }
  0x30   : > { %p134_p3 = pnand %p455_p9, %p133_p1 }
  0x31   : > { %s744_s27 = sand.u32 (!%p134_p3), 1, %s606_s12  }
  0x32   : > { %137 = sbr.rel (%p134_p3) target bundleno = 115 (0x73), region = 28  ;;  %s456_s28 = sshll.u32 (!%p134_p3), %s744_s27, 8 }
  0x33   : > { %s140_s30 = scalar_lea.sflag (!%p134_p3), [#allocation4], %s744_s27  ;;  %s750_s6 = scalar_lea.vmem (!%p134_p3), [#allocation3], %s456_s28 }
  0x39   : > { %593 = dma.done.wait (%p683_p6), %s140_s30, 4096  }
  0x3a   : > { %595 = vsyncadd (%p683_p6), %s140_s30, 4294963200  ;;  %s166_s29 = sld [smem:[#allocation2]]  ;;  %v167_v0 = vld [vmem:[%s750_s6] sm:$0xff]  ;;  %v168_v2 = vld [vmem:[%s750_s6 + $0x8] sm:$0xff]  ;;  %s789_s21 = scalar_lea.vmem [#allocation6], %s456_s28 }
  0x3b   : > { %v169_v3 = vld [vmem:[%s750_s6 + $0x10] sm:$0xff]  ;;  %v170_v7 = vld [vmem:[%s750_s6 + $0x18] sm:$0xff]  ;;  %v171_v8 = vld [vmem:[%s750_s6 + $0x20] sm:$0xff]  ;;  %s467_s3 = sshll.u32 %s661_s0, 12  ;;  %s375_s4 = sshll.u32 %s789_s21, 4  ;;  %s891_s4 = int_to_ptr.vmem [resolvable:$true] %s375_s4 }
  0x3c   : > { %v172_v9 = vld [vmem:[%s750_s6 + $0x28] sm:$0xff]  ;;  %v173_v13 = vld [vmem:[%s750_s6 + $0x30] sm:$0xff]  ;;  %v174_v14 = vld [vmem:[%s750_s6 + $0x38] sm:$0xff]  ;;  %s889_s7 = scalar_lea.hbm %s943_s2, %s467_s3  ;;  %s361_s8 = scalar_lea.sflag [#allocation5], %s744_s27 }
  0x3d   : > { %v175_v31 = vld [vmem:[%s750_s6 + $0x40] sm:$0xff]  ;;  %v176_v32 = vld [vmem:[%s750_s6 + $0x48] sm:$0xff]  ;;  %v177_v33 = vld [vmem:[%s750_s6 + $0x50] sm:$0xff]  ;;  %s548_s9 = scalar_lea.vmem %s891_s4, 4096  ;;  %p950_p11 = scmp.ne.s32.totalorder %s947_s22, 0 }
  0x3e   : > { %v178_v38 = vld [vmem:[%s750_s6 + $0x58] sm:$0xff]  ;;  %v179_v39 = vld [vmem:[%s750_s6 + $0x60] sm:$0xff]  ;;  %v180_v40 = vld [vmem:[%s750_s6 + $0x68] sm:$0xff]  ;;  %p549_p6 = scmp.ne.s32.totalorder %s891_s4, %s548_s9  ;;  %s619_s10 = smov [#allocation6]  }
  0x3f   : > { %v181_v45 = vld [vmem:[%s750_s6 + $0x70] sm:$0xff]  ;;  %v182_v50 = vld [vmem:[%s750_s6 + $0x78] sm:$0xff]  ;;  %s552_s15 = sshll.u32 %s619_s10, 4  ;;  %s553_s15 = int_to_ptr.vmem [resolvable:$false] %s552_s15 }
  0x40   : > { %v757_v1 = vstv %s166_s29  ;;  %p550_p12 = pnand %p549_p6, %p950_p11  ;;  %s554_s17 = scalar_lea.vmem %s553_s15, 8192 }
  0x41   : > { %v200_v4 = vsub.f32 %v167_v0, %v757_v1  ;;  %v201_v5 = vsub.f32 %v168_v2, %v757_v1  ;;  %v202_v6 = vsub.f32 %v169_v3, %v757_v1  ;;  %v203_v10 = vsub.f32 %v170_v7, %v757_v1  ;;  %p555_p8 = scmp.lt.s32.totalorder %s891_s4, %s553_s15  ;;  %p556_p10 = scmp.lt.s32.totalorder %s554_s17, %s548_s9 }
  0x42   : > { %v204_v11 = vsub.f32 %v171_v8, %v757_v1  ;;  %v205_v12 = vsub.f32 %v172_v9, %v757_v1  ;;  %v206_v18 = vsub.f32 %v173_v13, %v757_v1  ;;  %v207_v22 = vsub.f32 %v174_v14, %v757_v1  ;;  %v183_v8 = vld [vmem:[%s750_s6 + $0x80] sm:$0xff]  ;;  %v184_v9 = vld [vmem:[%s750_s6 + $0x88] sm:$0xff]  ;;  %p551_p13 = pneg %p550_p12 }
  0x43   : > { %v232_v15 = vmul.f32 0.01, %v200_v4  ;;  %v233_v16 = vmul.f32 0.01, %v201_v5  ;;  %v234_v17 = vmul.f32 0.01, %v202_v6  ;;  %v208_v47 = vsub.f32 %v175_v31, %v757_v1  ;;  %p557_p0 = por %p556_p10, %p555_p8 }
  0x44   : > { %v235_v19 = vmul.f32 0.01, %v203_v10  ;;  %v236_v20 = vmul.f32 0.01, %v204_v11  ;;  %v237_v21 = vmul.f32 0.01, %v205_v12  ;;  %v209_v48 = vsub.f32 %v176_v32, %v757_v1 }
  0x45   : > { %v264_v23 = vmax.f32 %v200_v4, %v232_v15  ;;  %v265_v24 = vmax.f32 %v201_v5, %v233_v16  ;;  %v266_v25 = vmax.f32 %v202_v6, %v234_v17  ;;  %v238_v26 = vmul.f32 0.01, %v206_v18  ;;  %v186_v15 = vld [vmem:[%s750_s6 + $0x98] sm:$0xff]  ;;  %v187_v16 = vld [vmem:[%s750_s6 + $0xa0] sm:$0xff]  ;;  %v188_v17 = vld [vmem:[%s750_s6 + $0xa8] sm:$0xff]  ;;  %p558_p2 = pnand %p557_p0, %p551_p13 }
  0x46   : > { %v267_v27 = vmax.f32 %v203_v10, %v235_v19  ;;  %v268_v28 = vmax.f32 %v204_v11, %v236_v20  ;;  %v269_v29 = vmax.f32 %v205_v12, %v237_v21  ;;  %v239_v30 = vmul.f32 0.01, %v207_v22  ;;  %v185_v10 = vld [vmem:[%s750_s6 + $0x90] sm:$0xff] }
  0x47   : > { %v296_v34 = vadd.f32 %v264_v23, %v757_v1  ;;  %v297_v35 = vadd.f32 %v265_v24, %v757_v1  ;;  %v298_v36 = vadd.f32 %v266_v25, %v757_v1  ;;  %v270_v37 = vmax.f32 %v206_v18, %v238_v26 }
  0x48   : > { %v299_v41 = vadd.f32 %v267_v27, %v757_v1  ;;  %v300_v42 = vadd.f32 %v268_v28, %v757_v1  ;;  %v301_v43 = vadd.f32 %v269_v29, %v757_v1  ;;  %v271_v44 = vmax.f32 %v207_v22, %v239_v30  ;;  %v189_v22 = vld [vmem:[%s750_s6 + $0xb0] sm:$0xff]  ;;  %v190_v27 = vld [vmem:[%s750_s6 + $0xb8] sm:$0xff] }
  0x49   : > { %328 = vst [vmem:[%s789_s21] sm:$0xff] %v296_v34  ;;  %329 = vst [vmem:[%s789_s21 + $0x8] sm:$0xff] %v297_v35  ;;  %v302_v46 = vadd.f32 %v270_v37, %v757_v1  ;;  %v210_v49 = vsub.f32 %v177_v33, %v757_v1  ;;  %v211_v52 = vsub.f32 %v178_v38, %v757_v1  ;;  %v240_v55 = vmul.f32 0.01, %v208_v47 }
  0x4a   : > { %330 = vst [vmem:[%s789_s21 + $0x10] sm:$0xff] %v298_v36  ;;  %331 = vst [vmem:[%s789_s21 + $0x18] sm:$0xff] %v299_v41  ;;  %v303_v51 = vadd.f32 %v271_v44, %v757_v1  ;;  %v212_v53 = vsub.f32 %v179_v39, %v757_v1  ;;  %v213_v54 = vsub.f32 %v180_v40, %v757_v1  ;;  %v241_v56 = vmul.f32 0.01, %v209_v48 }
  0x4b   : > { %332 = vst [vmem:[%s789_s21 + $0x20] sm:$0xff] %v300_v42  ;;  %333 = vst [vmem:[%s789_s21 + $0x28] sm:$0xff] %v301_v43  ;;  %v242_v57 = vmul.f32 0.01, %v210_v49  ;;  %v214_v58 = vsub.f32 %v181_v45, %v757_v1  ;;  %v243_v59 = vmul.f32 0.01, %v211_v52  ;;  %v215_v62 = vsub.f32 %v182_v50, %v757_v1 }
  0x4c   : > { %334 = vst [vmem:[%s789_s21 + $0x30] sm:$0xff] %v302_v46  ;;  %335 = vst [vmem:[%s789_s21 + $0x38] sm:$0xff] %v303_v51  ;;  %v244_v60 = vmul.f32 0.01, %v212_v53  ;;  %v245_v61 = vmul.f32 0.01, %v213_v54  ;;  %v272_v63 = vmax.f32 %v208_v47, %v240_v55  ;;  %v273_v0 = vmax.f32 %v209_v48, %v241_v56 }
  0x4d   : > { %v274_v2 = vmax.f32 %v210_v49, %v242_v57  ;;  %v246_v3 = vmul.f32 0.01, %v214_v58  ;;  %v275_v4 = vmax.f32 %v211_v52, %v243_v59  ;;  %v247_v7 = vmul.f32 0.01, %v215_v62  ;;  %v191_v48 = vld [vmem:[%s750_s6 + $0xc0] sm:$0xff]  ;;  %v192_v49 = vld [vmem:[%s750_s6 + $0xc8] sm:$0xff] }
  0x4e   : > { %v276_v5 = vmax.f32 %v212_v53, %v244_v60  ;;  %v277_v6 = vmax.f32 %v213_v54, %v245_v61  ;;  %v304_v11 = vadd.f32 %v272_v63, %v757_v1  ;;  %v305_v12 = vadd.f32 %v273_v0, %v757_v1  ;;  %v193_v50 = vld [vmem:[%s750_s6 + $0xd0] sm:$0xff]  ;;  %v194_v55 = vld [vmem:[%s750_s6 + $0xd8] sm:$0xff]  ;;  %v195_v56 = vld [vmem:[%s750_s6 + $0xe0] sm:$0xff] }
  0x4f   : > { %v306_v13 = vadd.f32 %v274_v2, %v757_v1  ;;  %v278_v14 = vmax.f32 %v214_v58, %v246_v3  ;;  %v307_v18 = vadd.f32 %v275_v4, %v757_v1  ;;  %v279_v21 = vmax.f32 %v215_v62, %v247_v7  ;;  %v196_v57 = vld [vmem:[%s750_s6 + $0xe8] sm:$0xff]  ;;  %v197_v62 = vld [vmem:[%s750_s6 + $0xf0] sm:$0xff]  ;;  %v198_v4 = vld [vmem:[%s750_s6 + $0xf8] sm:$0xff] }
  0x50   : > { %v308_v19 = vadd.f32 %v276_v5, %v757_v1  ;;  %v309_v20 = vadd.f32 %v277_v6, %v757_v1  ;;  %336 = vst [vmem:[%s789_s21 + $0x40] sm:$0xff] %v304_v11  ;;  %337 = vst [vmem:[%s789_s21 + $0x48] sm:$0xff] %v305_v12  ;;  %v216_v24 = vsub.f32 %v183_v8, %v757_v1 }
  0x51   : > { %338 = vst [vmem:[%s789_s21 + $0x50] sm:$0xff] %v306_v13  ;;  %v310_v23 = vadd.f32 %v278_v14, %v757_v1  ;;  %v217_v25 = vsub.f32 %v184_v9, %v757_v1  ;;  %v218_v26 = vsub.f32 %v185_v10, %v757_v1  ;;  %339 = vst [vmem:[%s789_s21 + $0x58] sm:$0xff] %v307_v18 }
  0x52   : > { %340 = vst [vmem:[%s789_s21 + $0x60] sm:$0xff] %v308_v19  ;;  %341 = vst [vmem:[%s789_s21 + $0x68] sm:$0xff] %v309_v20  ;;  %v311_v28 = vadd.f32 %v279_v21, %v757_v1  ;;  %v219_v29 = vsub.f32 %v186_v15, %v757_v1  ;;  %v220_v30 = vsub.f32 %v187_v16, %v757_v1  ;;  %v248_v32 = vmul.f32 0.01, %v216_v24 }
  0x53   : > { %v221_v31 = vsub.f32 %v188_v17, %v757_v1  ;;  %342 = vst [vmem:[%s789_s21 + $0x70] sm:$0xff] %v310_v23  ;;  %v249_v33 = vmul.f32 0.01, %v217_v25  ;;  %v250_v34 = vmul.f32 0.01, %v218_v26  ;;  %v222_v35 = vsub.f32 %v189_v22, %v757_v1 }
  0x54   : > { %343 = vst [vmem:[%s789_s21 + $0x78] sm:$0xff] %v311_v28  ;;  %v251_v36 = vmul.f32 0.01, %v219_v29  ;;  %v252_v37 = vmul.f32 0.01, %v220_v30  ;;  %v223_v39 = vsub.f32 %v190_v27, %v757_v1  ;;  %v280_v40 = vmax.f32 %v216_v24, %v248_v32 }
  0x55   : > { %v253_v38 = vmul.f32 0.01, %v221_v31  ;;  %v281_v41 = vmax.f32 %v217_v25, %v249_v33  ;;  %v282_v42 = vmax.f32 %v218_v26, %v250_v34  ;;  %v254_v43 = vmul.f32 0.01, %v222_v35 }
  0x56   : > { %v283_v44 = vmax.f32 %v219_v29, %v251_v36  ;;  %v284_v45 = vmax.f32 %v220_v30, %v252_v37  ;;  %v255_v47 = vmul.f32 0.01, %v223_v39  ;;  %v312_v51 = vadd.f32 %v280_v40, %v757_v1 }
  0x57   : > { %v285_v46 = vmax.f32 %v221_v31, %v253_v38  ;;  %v313_v52 = vadd.f32 %v281_v41, %v757_v1  ;;  %v314_v53 = vadd.f32 %v282_v42, %v757_v1  ;;  %v286_v54 = vmax.f32 %v222_v35, %v254_v43 }
  0x58   : > { %v315_v58 = vadd.f32 %v283_v44, %v757_v1  ;;  %v316_v59 = vadd.f32 %v284_v45, %v757_v1  ;;  %v287_v61 = vmax.f32 %v223_v39, %v255_v47  ;;  %344 = vst [vmem:[%s789_s21 + $0x80] sm:$0xff] %v312_v51  ;;  %v224_v0 = vsub.f32 %v191_v48, %v757_v1 }
  0x59   : > { %v317_v60 = vadd.f32 %v285_v46, %v757_v1  ;;  %345 = vst [vmem:[%s789_s21 + $0x88] sm:$0xff] %v313_v52  ;;  %346 = vst [vmem:[%s789_s21 + $0x90] sm:$0xff] %v314_v53  ;;  %v318_v63 = vadd.f32 %v286_v54, %v757_v1  ;;  %v225_v2 = vsub.f32 %v192_v49, %v757_v1 }
  0x5a   : > { %v226_v3 = vsub.f32 %v193_v50, %v757_v1  ;;  %347 = vst [vmem:[%s789_s21 + $0x98] sm:$0xff] %v315_v58  ;;  %348 = vst [vmem:[%s789_s21 + $0xa0] sm:$0xff] %v316_v59  ;;  %v319_v5 = vadd.f32 %v287_v61, %v757_v1  ;;  %v227_v6 = vsub.f32 %v194_v55, %v757_v1  ;;  %v256_v9 = vmul.f32 0.01, %v224_v0 }
  0x5b   : > { %349 = vst [vmem:[%s789_s21 + $0xa8] sm:$0xff] %v317_v60  ;;  %v228_v7 = vsub.f32 %v195_v56, %v757_v1  ;;  %v229_v8 = vsub.f32 %v196_v57, %v757_v1  ;;  %350 = vst [vmem:[%s789_s21 + $0xb0] sm:$0xff] %v318_v63  ;;  %v257_v10 = vmul.f32 0.01, %v225_v2  ;;  %v230_v12 = vsub.f32 %v197_v62, %v757_v1 }
  0x5c   : > { %v258_v11 = vmul.f32 0.01, %v226_v3  ;;  %351 = vst [vmem:[%s789_s21 + $0xb8] sm:$0xff] %v319_v5  ;;  %v259_v13 = vmul.f32 0.01, %v227_v6  ;;  %v231_v16 = vsub.f32 %v198_v4, %v757_v1  ;;  %v288_v17 = vmax.f32 %v224_v0, %v256_v9 }
  0x5d   : > { %v260_v14 = vmul.f32 0.01, %v228_v7  ;;  %v261_v15 = vmul.f32 0.01, %v229_v8  ;;  %v289_v18 = vmax.f32 %v225_v2, %v257_v10  ;;  %v262_v20 = vmul.f32 0.01, %v230_v12 }
  0x5e   : > { %v290_v19 = vmax.f32 %v226_v3, %v258_v11  ;;  %v291_v21 = vmax.f32 %v227_v6, %v259_v13  ;;  %v263_v24 = vmul.f32 0.01, %v231_v16  ;;  %v320_v25 = vadd.f32 %v288_v17, %v757_v1 }
  0x5f   : > { %v292_v22 = vmax.f32 %v228_v7, %v260_v14  ;;  %v293_v23 = vmax.f32 %v229_v8, %v261_v15  ;;  %v321_v26 = vadd.f32 %v289_v18, %v757_v1  ;;  %v294_v28 = vmax.f32 %v230_v12, %v262_v20 }
  0x60   : > { %v322_v27 = vadd.f32 %v290_v19, %v757_v1  ;;  %v323_v29 = vadd.f32 %v291_v21, %v757_v1  ;;  %v295_v32 = vmax.f32 %v231_v16, %v263_v24  ;;  %352 = vst [vmem:[%s789_s21 + $0xc0] sm:$0xff] %v320_v25 }
  0x61   : > { %v324_v30 = vadd.f32 %v292_v22, %v757_v1  ;;  %v325_v31 = vadd.f32 %v293_v23, %v757_v1  ;;  %353 = vst [vmem:[%s789_s21 + $0xc8] sm:$0xff] %v321_v26  ;;  %v326_v33 = vadd.f32 %v294_v28, %v757_v1 }
  0x62   : > { %354 = vst [vmem:[%s789_s21 + $0xd0] sm:$0xff] %v322_v27  ;;  %355 = vst [vmem:[%s789_s21 + $0xd8] sm:$0xff] %v323_v29  ;;  %v327_v34 = vadd.f32 %v295_v32, %v757_v1 }
  0x63   : > { %356 = vst [vmem:[%s789_s21 + $0xe0] sm:$0xff] %v324_v30  ;;  %357 = vst [vmem:[%s789_s21 + $0xe8] sm:$0xff] %v325_v31 }
  0x64   : > { %358 = vst [vmem:[%s789_s21 + $0xf0] sm:$0xff] %v326_v33  ;;  %359 = vst [vmem:[%s789_s21 + $0xf8] sm:$0xff] %v327_v34 }
  0x65   : > { %561 = shalt.err (!%p558_p2)
}
  0x66   : > { %s562_s18 = scalar_lea.hbm %s889_s7, 4096  ;;  %s566_s25 = scalar_lea.hbm %s943_s2, 8192 }
  0x67   : > { %p563_p4 = scmp.ne.s32.totalorder %s889_s7, %s562_s18  ;;  %p567_p9 = scmp.lt.u32.totalorder %s889_s7, %s943_s2 }
  0x68   : > { %p568_p1 = scmp.lt.u32.totalorder %s566_s25, %s562_s18  ;;  %p570_p6 = scmp.lt.u32.totalorder %s562_s18, %s889_s7 }
  0x69   : > { %p564_p5 = pnand %p563_p4, %p950_p11 }
  0x6a   : > { %p569_p3 = por %p568_p1, %p567_p9 }
  0x6b   : > { %p565_p7 = pneg %p564_p5 }
  0x6c   : > { %p571_p12 = por %p570_p6, %p569_p3 }
  0x6e   : > { %p572_p13 = pnand %p571_p12, %p565_p7 }
  0x70   : > { %575 = shalt.err (!%p572_p13)
}
  0x71   : > { %s620_s30 = smov 1024   ;;  %s621_s6 = smov 64  }
  0x72   : > { %470 = dma.vmem_to_hbm [thread:$0]  (%p950_p11), %s891_s4, 4096, %s889_s7, %s361_s8, %s620_s30, %s620_s30, %s621_s6  }
  0x73 PF: > { %s390_s29 = sand.u32 1, %s602_s11   ;;  %p951_p8 = scmp.ne.s32.totalorder %s948_s23, 0 }
  0x74   : > { %p952_p10 = scmp.ge.s32.totalorder %s614_s14, 2  ;;  %s391_s21 = scalar_lea.sflag [#allocation5], %s390_s29 }
  0x76   : > { %p477_p0 = pnand %p952_p10, %p951_p8 }
  0x78   : > { %597 = dma.done.wait (!%p477_p0), %s391_s21, 4096  }
  0x79   : > { %599 = vsyncadd (!%p477_p0), %s391_s21, 4294963200  ;;  %p16_p2 = scmp.ge.s32.totalorder %s665_s16, 4   ;;  %s953_s11 = smov %s606_s12 }
  0x7a   : > { %s954_s12 = smov %s610_s13  ;;  %s955_s13 = smov %s677_s19 }
  0x7b   : > { %s956_s14 = smov %s665_s16  ;;  %18 = sbr.rel (!%p16_p2) target bundleno = 7 (0x7), region = 73 }
  0x82   :  { %396 = vsyncpa [#allocation4], 1 }
  0x83   :  { %398 = vsyncpa [#allocation4 + $0x1], 1 }
  0x84   :  { %399 = vsyncpa [#allocation5], 1 }
  0x85   :  { %401 = vsyncpa [#allocation5 + $0x1], 1 }

</bundles_post_ra>
